<compile_context>
chip_gen: v6e
topology: v6e:2x2x1
jax: 0.10.0
libtpu: 0.0.40
codegen_flags: <defaults>
</compile_context>

<pallas_src>
import jax
import jax.numpy as jnp
from jax import lax
from jax.experimental import pallas as pl
from jax.experimental.pallas import tpu as pltpu

KERNEL = 15
PAD = KERNEL // 2  # 7


def _band(shape, row_dim, col_dim):
    """0/1 band matrix: 1.0 where |row - col| <= PAD (encodes the 15-tap window
    AND the implicit zero padding: missing taps just contribute nothing)."""
    r = lax.broadcasted_iota(jnp.int32, shape, row_dim)
    c = lax.broadcasted_iota(jnp.int32, shape, col_dim)
    d = r - c
    return jnp.where((d <= PAD) & (d >= -PAD), 1.0, 0.0).astype(jnp.float32)


def _avgpool15_kernel(x_ref, o_ref):
    # x_ref / o_ref: (TC, H, W) channel tile in VMEM.
    x = x_ref[...].astype(jnp.float32)
    tc, H, W = x.shape

    # ---- W pass on the MXU: (TC*H, W) @ band_w(W, W) ----
    band_w = _band((W, W), 0, 1)
    tmp = lax.dot_general(
        x.reshape(tc * H, W), band_w,
        dimension_numbers=(((1,), (0,)), ((), ())),
        precision=lax.Precision.HIGHEST,
        preferred_element_type=jnp.float32,
    ).reshape(tc, H, W)

    # ---- H pass on the MXU as a batched matmul (no transposes) ----
    # band_h[c, i, p] = 1 iff |i - p| <= 7 ; out[c,i,j] = sum_p band_h * tmp[c,p,j]
    band_h = _band((tc, H, H), 1, 2)
    win = lax.dot_general(
        band_h, tmp,
        dimension_numbers=(((2,), (1,)), ((0,), (0,))),
        precision=lax.Precision.HIGHEST,
        preferred_element_type=jnp.float32,
    )

    o_ref[...] = (win * (1.0 / (KERNEL * KERNEL))).astype(o_ref.dtype)


def expend_forward(x, c_tile=None):
    """AvgPool2d(15, stride=1, padding=7, count_include_pad=True) over the last
    two dims.  x: (C, H, W) or (H, W); returns the same shape, matching
    Expend.forward = unsqueeze(0) -> AvgPool2d -> squeeze()."""
    squeeze_out = x.ndim == 2
    if squeeze_out:
        x = x[None]
    C, H, W = x.shape

    if c_tile is None:
        # ~2 MiB of input per grid step keeps (input + tmp + band_h + output)
        # f32 intermediates, double-buffered, well under the default scoped
        # VMEM limit even on v7x (64 MiB physical / 32 MiB default scoped).
        budget = 2 << 20
        c_tile = max(1, min(C, budget // max(H * W * 4, 1)))
    c_tile = int(min(c_tile, C))

    out = pl.pallas_call(
        _avgpool15_kernel,
        out_shape=jax.ShapeDtypeStruct((C, H, W), x.dtype),
        grid=(pl.cdiv(C, c_tile),),
        in_specs=[pl.BlockSpec((c_tile, H, W), lambda i: (i, 0, 0))],
        out_specs=pl.BlockSpec((c_tile, H, W), lambda i: (i, 0, 0)),
        compiler_params=pltpu.CompilerParams(
            dimension_semantics=("parallel",)),
        cost_estimate=pl.CostEstimate(
            flops=2 * C * H * W * KERNEL * KERNEL,
            transcendentals=0,
            bytes_accessed=2 * C * H * W * x.dtype.itemsize,
        ),
    )(x)
    return out[0] if squeeze_out else out


def _reference(x):
    # Pure-JAX reference: AvgPool2d(15, stride=1, padding=7, count_include_pad=True)
    xp = jnp.pad(x.astype(jnp.float32), ((0, 0), (PAD, PAD), (PAD, PAD)))
    summed = lax.reduce_window(
        xp, 0.0, lax.add,
        window_dimensions=(1, KERNEL, KERNEL),
        window_strides=(1, 1, 1),
        padding="VALID",
    )
    return (summed / (KERNEL * KERNEL)).astype(x.dtype)


if __name__ == "__main__":
    key = jax.random.PRNGKey(0)
    # x is (C, H, W): forward does unsqueeze(0) -> pool -> squeeze(), which is
    # shape-preserving, so the output is also (C, H, W).
    C, H, W = 4, 16, 16
    x = jax.random.normal(key, (C, H, W), dtype=jnp.float32)

    # c_tile=2 exercises a multi-step ("parallel") grid over channels.
    out = expend_forward(x, c_tile=2)
    out = jax.block_until_ready(out)

    ref = _reference(x)
    assert out.shape == (C, H, W), out.shape
    max_err = float(jnp.max(jnp.abs(out - ref)))
    assert jnp.allclose(out, ref, atol=1e-4, rtol=1e-4), max_err

    print("KERNEL_OK")
</pallas_src>

<mosaic_0001>
module attributes {stable_mosaic.version = 11 : i64} {
  func.func @_avgpool15_kernel(%arg0: i32, %arg1: memref<2x16x16xf32, #tpu.memory_space<vmem>>, %arg2: memref<2x16x16xf32, #tpu.memory_space<vmem>>) attributes {dimension_semantics = [#tpu.dimension_semantics<parallel>], iteration_bounds = array<i64: 2>, scalar_prefetch = 0 : i64, scratch_operands = 0 : i64, tpu.core_type = #tpu.core_type<tc>, window_params = [{transform_indices = @transform_0, window_bounds = array<i64: 2, 16, 16>}, {transform_indices = @transform_1, window_bounds = array<i64: 2, 16, 16>}]} {
    %c0 = arith.constant 0 : index
    %c0_0 = arith.constant 0 : index
    %c0_1 = arith.constant 0 : index
    %0 = vector.load %arg1[%c0, %c0_0, %c0_1] : memref<2x16x16xf32, #tpu.memory_space<vmem>>, vector<2x16x16xf32>
    %1 = tpu.iota {dimensions = array<i32: 0>} : vector<16x16xi32>
    %2 = tpu.iota {dimensions = array<i32: 1>} : vector<16x16xi32>
    %3 = arith.subi %1, %2 : vector<16x16xi32>
    %c7_i32 = arith.constant 7 : i32
    %4 = vector.broadcast %c7_i32 : i32 to vector<16x16xi32>
    %5 = arith.cmpi sle, %3, %4 : vector<16x16xi32>
    %c-7_i32 = arith.constant -7 : i32
    %6 = vector.broadcast %c-7_i32 : i32 to vector<16x16xi32>
    %7 = arith.cmpi sge, %3, %6 : vector<16x16xi32>
    %8 = arith.andi %5, %7 : vector<16x16xi1>
    %cst = arith.constant 1.000000e+00 : f32
    %cst_2 = arith.constant 0.000000e+00 : f32
    %9 = vector.broadcast %cst : f32 to vector<16x16xf32>
    %10 = vector.broadcast %cst_2 : f32 to vector<16x16xf32>
    %11 = arith.select %8, %9, %10 : vector<16x16xi1>, vector<16x16xf32>
    %12 = vector.shape_cast %0 : vector<2x16x16xf32> to vector<32x16xf32>
    %cst_3 = arith.constant dense<0.000000e+00> : vector<32x16xf32>
    %13 = tpu.matmul %12, %11, %cst_3 {dimension_numbers = #tpu.dot_dimension_numbers<[1], [0], [0], [1], [0, 0, 1, 1], [], []>, precision = #tpu.contract_precision<fp32>} : vector<32x16xf32>, vector<16x16xf32>, vector<32x16xf32> -> vector<32x16xf32>
    %14 = vector.shape_cast %13 : vector<32x16xf32> to vector<2x16x16xf32>
    %15 = tpu.iota {dimensions = array<i32: 1>} : vector<2x16x16xi32>
    %16 = tpu.iota {dimensions = array<i32: 2>} : vector<2x16x16xi32>
    %17 = arith.subi %15, %16 : vector<2x16x16xi32>
    %c7_i32_4 = arith.constant 7 : i32
    %18 = vector.broadcast %c7_i32_4 : i32 to vector<2x16x16xi32>
    %19 = arith.cmpi sle, %17, %18 : vector<2x16x16xi32>
    %c-7_i32_5 = arith.constant -7 : i32
    %20 = vector.broadcast %c-7_i32_5 : i32 to vector<2x16x16xi32>
    %21 = arith.cmpi sge, %17, %20 : vector<2x16x16xi32>
    %22 = arith.andi %19, %21 : vector<2x16x16xi1>
    %cst_6 = arith.constant 1.000000e+00 : f32
    %cst_7 = arith.constant 0.000000e+00 : f32
    %23 = vector.broadcast %cst_6 : f32 to vector<2x16x16xf32>
    %24 = vector.broadcast %cst_7 : f32 to vector<2x16x16xf32>
    %25 = arith.select %22, %23, %24 : vector<2x16x16xi1>, vector<2x16x16xf32>
    %cst_8 = arith.constant dense<0.000000e+00> : vector<2x16x16xf32>
    %26 = tpu.matmul %25, %14, %cst_8 {dimension_numbers = #tpu.dot_dimension_numbers<[2], [1], [1], [2], [0, 0, 0, 1, 1, 2], [0], [0]>, precision = #tpu.contract_precision<fp32>} : vector<2x16x16xf32>, vector<2x16x16xf32>, vector<2x16x16xf32> -> vector<2x16x16xf32>
    %cst_9 = arith.constant 0.00444444455 : f32
    %27 = vector.broadcast %cst_9 : f32 to vector<2x16x16xf32>
    %28 = arith.mulf %26, %27 : vector<2x16x16xf32>
    %c0_10 = arith.constant 0 : index
    %c0_11 = arith.constant 0 : index
    %c0_12 = arith.constant 0 : index
    %29 = vector.load %arg2[%c0_10, %c0_11, %c0_12] : memref<2x16x16xf32, #tpu.memory_space<vmem>>, vector<2x16x16xf32>
    tpu.vector_store %arg2[%c0_10, %c0_11, %c0_12], %28 {strides = array<i32>} : memref<2x16x16xf32, #tpu.memory_space<vmem>>, vector<2x16x16xf32>,
    return
  }
  func.func @transform_0(%arg0: i32) -> (i32, i32, i32) {
    %c0_i32 = arith.constant 0 : i32
    %c0_i32_0 = arith.constant 0 : i32
    %c0_i32_1 = arith.constant 0 : i32
    return %arg0, %c0_i32, %c0_i32_0 : i32, i32, i32
  }
  func.func @transform_1(%arg0: i32) -> (i32, i32, i32) {
    %c0_i32 = arith.constant 0 : i32
    %c0_i32_0 = arith.constant 0 : i32
    %c0_i32_1 = arith.constant 0 : i32
    return %arg0, %c0_i32, %c0_i32_0 : i32, i32, i32
  }
}

</mosaic_0001>

<bundles_post_ra>
// kernel: tpu_custom_call.1
= control target key start
LH: loop header
LB: loop body
LE: loop exit
PB: predicated region body
PF: predicated region fallthrough
CT: control target
= control target key end

     0   :  { %6 = vsyncpa [#allocation3], 0  ;;  %s2585_s0 = inlined_call_operand.hbm [shape: f32[4,16,16], index: 0, kind: input, shape index: {}]   ;;  %s2586_s1 = inlined_call_operand.hbm [shape: f32[4,16,16], index: 1, kind: output, shape index: {}]  }
   0x1   :  { %8 = vsyncpa [#allocation3 + $0x1], 0 }
   0x2   :  { %9 = vsyncpa [#allocation4], 0 }
   0x3   :  { %11 = vsyncpa [#allocation4 + $0x1], 0  ;;  %s2282_s6 = smov 0   ;;  %s2284_s7 = smov 0  }
   0x4   :  { %s2286_s8 = smov 0   ;;  %s2288_s9 = smov 0  }
   0x5 LB: > { %s2303_s10 = sadd.s32 4294967295, %s2262_s9   ;;  %s1852_s11 = sadd.s32 4294967294, %s2262_s9   ;;  %s2262_s9 = sphi %s2288_s9, %s2605_s9   ;;  %s2258_s8 = sphi %s2286_s8, %s2604_s8   ;;  %s2254_s7 = sphi %s2284_s7, %s2603_s7   ;;  %s2250_s6 = sphi %s2282_s6, %s2602_s6  }
   0x6   : > { %s2307_s12 = sadd.s32 1, %s2262_s9   ;;  %s24_s13 = sadd.s32 1, %s2258_s8 }
   0x7   : > { %s21_s14 = ssub.s32 %s2262_s9, %s2307_s12  ;;  %p31_p0 = scmp.ne.s32.totalorder %s2258_s8, %s2254_s7 }
   0x8   : > { %p22_p1 = scmp.eq.s32.totalorder %s21_s14, 0  ;;  %p32_p2 = scmp.eq.s32.totalorder %s2262_s9, 0 }
   0x9   : > { %p37_p3 = scmp.ne.s32.totalorder %s2254_s7, %s2250_s6  ;;  %p38_p4 = scmp.eq.s32.totalorder %s2303_s10, 0 }
   0xa   : > { %s2319_s15 = scalar_select %p22_p1, %s2258_s8, %s24_s13  }
   0xb   : > { %p2321_p5 = por %p32_p2, %p31_p0  ;;  %p2325_p6 = por %p38_p4, %p37_p3 }
   0xc   : > { %p61_p7 = scmp.eq.s32.totalorder %s2303_s10, 1  ;;  %p67_p8 = scmp.eq.s32.totalorder %s1852_s11, 1 }
   0xd   : > { %s2590_s17 = scalar_select %p2325_p6, 1, 0 }
   0xe   : > { %p2130_p10 = scmp.lt.s32.totalorder %s2262_s9, 2  ;;  %p2332_p11 = por %p61_p7, %p31_p0 }
   0xf   : > { %p2336_p12 = por %p67_p8, %p37_p3  ;;  %s87_s20 = sand.u32 1, %s2258_s8  }
  0x10   : > { %s2591_s18 = scalar_select %p2332_p11, 1, 0 }
  0x11   : > { %s2592_s19 = scalar_select %p2336_p12, 1, 0 }
  0x12   : > { %s1887_s21 = sshll.u32 %s2262_s9, 9  ;;  %s1855_s22 = sshll.u32 %s87_s20, 5 }
  0x13   : > { %s2345_s25 = scalar_lea.hbm %s2585_s0, %s1887_s21  ;;  %s91_s26 = scalar_lea.vmem [#allocation2], %s1855_s22 }
  0x14   : > { %s99_s27 = sshll.u32 %s91_s26, 4  ;;  %p2349_p13 = pnand %p2130_p10, %p2321_p5  ;;  %s2353_s27 = int_to_ptr.vmem [resolvable:$true] %s99_s27 }
  0x15   : > { %s2355_s29 = scalar_lea.sflag [#allocation3], %s87_s20  ;;  %s2170_s30 = scalar_lea.hbm %s2345_s25, 512 }
  0x16   : > { %p2171_p0 = scmp.ne.s32.totalorder %s2345_s25, %s2170_s30  ;;  %p2172_p1 = pneg %p2349_p13 }
  0x17   : > { %s2175_s4 = scalar_lea.hbm %s2585_s0, 1024  ;;  %p2176_p4 = scmp.lt.s32.totalorder %s2345_s25, %s2585_s0 }
  0x18   : > { %p2173_p2 = pnand %p2172_p1, %p2171_p0  ;;  %p2177_p5 = scmp.lt.s32.totalorder %s2175_s4, %s2170_s30 }
  0x1a   : > { %p2174_p3 = pneg %p2173_p2  ;;  %p2178_p7 = por %p2177_p5, %p2176_p4 }
  0x1c   : > { %p2179_p8 = pnand %p2178_p7, %p2174_p3 }
  0x1e   : > { %2182 = shalt.err (!%p2179_p8)
}
  0x1f   : > { %s2183_s13 = scalar_lea.vmem %s2353_s27, 512  ;;  %s2264_s14 = smov [#allocation2]  }
  0x20   : > { %p2184_p10 = scmp.ne.s32.totalorder %s2353_s27, %s2183_s13  ;;  %s2188_s16 = sshll.u32 %s2264_s14, 4  ;;  %s2189_s16 = int_to_ptr.vmem [resolvable:$false] %s2188_s16 }
  0x21   : > { %s2190_s20 = scalar_lea.vmem %s2189_s16, 1024  ;;  %p2191_p2 = scmp.lt.s32.totalorder %s2353_s27, %s2189_s16 }
  0x22   : > { %p2186_p9 = pnand %p2184_p10, %p2172_p1  ;;  %p2192_p12 = scmp.lt.s32.totalorder %s2190_s20, %s2183_s13 }
  0x24   : > { %p2187_p0 = pneg %p2186_p9  ;;  %p2193_p11 = por %p2192_p12, %p2191_p2 }
  0x26   : > { %p2194_p6 = pnand %p2193_p11, %p2187_p0 }
  0x28   : > { %2197 = shalt.err (!%p2194_p6)
}
  0x29   : > { %s2265_s21 = smov 128   ;;  %s2266_s22 = smov 8  }
  0x2a   : > { %2125 = dma.hbm_to_vmem [thread:$0]  (!%p2349_p13), %s2345_s25, 512, %s2353_s27, %s2355_s29, %s2265_s21, %s2265_s21, %s2266_s22  }
  0x2b   : > { %p1859_p9 = scmp.ge.s32.totalorder %s2262_s9, 1  ;;  %p107_p1 = scmp.lt.s32.totalorder %s2262_s9, 3 }
  0x2d   : > { %p108_p3 = pnand %p1859_p9, %p107_p1 }
  0x2e   : > { %s2379_s23 = sand.u32 (!%p108_p3), 1, %s2254_s7   ;;  %p2594_p6 = scmp.ne.s32.totalorder (!%p108_p3), %s2590_s17, 0 }
  0x2f   : > { %111 = sbr.rel (%p108_p3) target bundleno = 541 (0x21d), region = 24  ;;  %s1860_s24 = sshll.u32 (!%p108_p3), %s2379_s23, 5 }
  0x30   : > { %s114_s26 = scalar_lea.sflag (!%p108_p3), [#allocation3], %s2379_s23  ;;  %s117_s30 = scalar_lea.vmem (!%p108_p3), [#allocation2], %s1860_s24 }
  0x34   : > { %2241 = dma.done.wait (%p2594_p6), %s114_s26, 512  }
  0x35   : > { %2243 = vsyncadd (%p2594_p6), %s114_s26, 4294966784  ;;  %v142_v0 = vlaneseq  ;;  %vm157_vm0 = vcmask 130048   ;;  %v2267_v7 = vmov 0.0   ;;  %v138_v9 = vld [vmem:[%s117_s30] sm:$0xff]  ;;  %v139_v10 = vld [vmem:[%s117_s30 + $0x8] sm:$0xff]  ;;  %v2268_v21 = vmov 1.0  }
  0x36   : > { %v140_v11 = vld [vmem:[%s117_s30 + $0x10] sm:$0xff]  ;;  %v159_v12 = vsel %vm157_vm0, %v138_v9, 0  ;;  %v162_v13 = vsel %vm157_vm0, %v139_v10, 0  ;;  %v141_v14 = vld [vmem:[%s117_s30 + $0x18] sm:$0xff]  ;;  %s135_s17 = scalar_lea.vmem [#allocation5], %s1860_s24  ;;  %s1889_s27 = sshll.u32 %s2303_s10, 9 }
  0x37   : > { %v143_v1 = vshrl.u32 %v142_v0, 7  ;;  %v146_v2 = vand.u32 127, %v142_v0  ;;  %v2403_v16 = vand.u32 4294901760, %v159_v12  ;;  %v2405_v17 = vand.u32 4294901760, %v162_v13  ;;  %s1779_s25 = sshll.u32 %s135_s17, 4  ;;  %s2540_s2 = scalar_lea.hbm %s2586_s1, %s1889_s27  ;;  %s2535_s25 = int_to_ptr.vmem [resolvable:$true] %s1779_s25 }
  0x38   : > { %v165_v19 = vsel %vm157_vm0, %v140_v11, 0  ;;  %v168_v23 = vsel %vm157_vm0, %v141_v14, 0  ;;  %s1765_s3 = scalar_lea.sflag [#allocation4], %s2379_s23  ;;  %s2198_s10 = scalar_lea.vmem %s2535_s25, 512 }
  0x39   : > { %v144_v3 = vadd.s32 8, %v143_v1  ;;  %v147_v4 = vsub.s32 %v143_v1, %v146_v2  ;;  %v2417_v22 = vand.u32 4294901760, %v165_v19  ;;  %v236_v24 = vsub.f32 %v159_v12, %v2403_v16  ;;  %1988 = vmatprep.mubr.f32.mxu1 %v2403_v16  ;;  %p2199_p11 = scmp.ne.s32.totalorder %s2535_s25, %s2198_s10  ;;  %p2599_p12 = scmp.ne.s32.totalorder %s2591_s18, 0 }
  0x3a   : > { %v246_v26 = vsub.f32 %v162_v13, %v2405_v17  ;;  %v265_v29 = vand.u32 4294901760, %v168_v23  ;;  %s2269_s4 = smov [#allocation5]  }
  0x3b   : > { %v148_v5 = vsub.s32 %v144_v3, %v146_v2  ;;  %vm2389_vm1 = vcmp.ge.s32.totalorder %v147_v4, 4294967289  ;;  %v256_v28 = vsub.f32 %v165_v19, %v2417_v22  ;;  %v237_v30 = vand.u32 4294901760, %v236_v24  ;;  %p2200_p13 = pnand %p2199_p11, %p2599_p12  ;;  %s2202_s5 = sshll.u32 %s2269_s4, 4  ;;  %s2203_s5 = int_to_ptr.vmem [resolvable:$false] %s2202_s5 }
  0x3c   : > { %v2395_v8 = vsel %vm2389_vm1, 1.0, %v2267_v7  ;;  %v247_v32 = vand.u32 4294901760, %v246_v26  ;;  %v266_v35 = vsub.f32 %v168_v23, %v265_v29  ;;  %s2204_s11 = scalar_lea.vmem %s2203_s5, 1024  ;;  %p2205_p5 = scmp.lt.s32.totalorder %s2535_s25, %s2203_s5 }
  0x3d   : > { %vm150_vm2 = vcmp.le.s32.totalorder %v148_v5, 7  ;;  %vm152_vm3 = vcmp.ge.s32.totalorder %v148_v5, 4294967289  ;;  %v310_v18 = vsub.f32 %v2395_v8, %v2395_v8  ;;  %v257_v34 = vand.u32 4294901760, %v256_v28  ;;  %p2201_p4 = pneg %p2200_p13  ;;  %p2206_p7 = scmp.lt.s32.totalorder %s2204_s11, %s2198_s10 }
  0x3e   : > { %vm2399_vm4 = vmand %vm150_vm2, %vm152_vm3  ;;  %v238_v36 = vsub.f32 %v236_v24, %v237_v30  ;;  %v248_v38 = vsub.f32 %v246_v26, %v247_v32  ;;  %v267_v40 = vand.u32 4294901760, %v266_v35  ;;  %v747_v48 = vsel %vm157_vm0, %v2395_v8, 0 }
  0x3f   : > { %v2412_v20 = vsel %vm2399_vm4, 1.0, %v2267_v7  ;;  %1974 = vmatprep.subr.msk.mxu0 %vm2399_vm4, %v2268_v21  ;;  %v311_v27 = vand.u32 4294901760, %v310_v18  ;;  %v258_v39 = vsub.f32 %v256_v28, %v257_v34  ;;  %v2471_v49 = vsub.f32 %v747_v48, %v747_v48  ;;  %p2207_p8 = por %p2206_p7, %p2205_p5 }
  0x40   : > { %1975 = vmatpush3.msk.msra.mxu0 %vm2399_vm4, %v2268_v21  ;;  %v304_v25 = vsub.f32 %v2412_v20, %v2412_v20  ;;  %v239_v41 = vand.u32 4294901760, %v238_v36  ;;  %v249_v43 = vand.u32 4294901760, %v248_v38  ;;  %v268_v46 = vsub.f32 %v266_v35, %v267_v40 }
  0x41   : > { %1976 = vmatprep.subr.msk.mxu0 %vm2389_vm1, %v2268_v21  ;;  %v312_v33 = vsub.f32 %v310_v18, %v311_v27  ;;  %v259_v45 = vand.u32 4294901760, %v258_v39  ;;  %v2474_v50 = vand.u32 4294901760, %v2471_v49  ;;  %v750_v63 = vsel %vm157_vm0, %v2412_v20, 0  ;;  %p2208_p10 = pnand %p2207_p8, %p2201_p4 }
  0x42   : > { %1977 = vmatpush3.msk.msra.mxu0 %vm2389_vm1, %v2268_v21  ;;  %v305_v31 = vand.u32 4294901760, %v304_v25  ;;  %1978 = vmatprep.mubr.f32.mxu0 %v239_v41  ;;  %v269_v47 = vand.u32 4294901760, %v268_v46  ;;  %v2483_v5 = vsub.f32 %v750_v63, %v750_v63 }
  0x43   : > { %1994 = vmatprep.subr.mxu0 %v304_v25  ;;  %v313_v44 = vand.u32 4294901760, %v312_v33  ;;  %1979 = vmatmul.mubr.f32.vlgmr.msra.gmra.mxu0 %v249_v43  ;;  %v822_v51 = vsub.f32 %v2471_v49, %v2474_v50 }
  0x44   : > { %v306_v37 = vsub.f32 %v304_v25, %v305_v31  ;;  %1981 = vmatprep.mubr.f32.mxu0 %v259_v45  ;;  %1995 = vmatpush3.msra.mxu0 %v304_v25  ;;  %v2486_v15 = vand.u32 4294901760, %v2483_v5 }
  0x45   : > { %1996 = vmatprep.subr.mxu0 %v310_v18  ;;  %v2478_v52 = vand.u32 4294901760, %v822_v51 }
  0x46   : > { %v307_v42 = vand.u32 4294901760, %v306_v37  ;;  %1997 = vmatpush3.msra.mxu0 %v310_v18 }
  0x47   : > { %1982 = vmatmul.mubr.f32.gmra.mxu0 %v269_v47  ;;  %2014 = vmatprep.subr.mxu0 %v305_v31 }
  0x48   : > { %1984 = vmatprep.subr.mxu1 %v307_v42  ;;  %1998 = vmatprep.mubr.f32.mxu0 %v236_v24 }
  0x49   : > { %1985 = vmatpush3.msra.mxu1 %v307_v42 }
  0x4a   : > { %1986 = vmatprep.subr.mxu1 %v313_v44 }
  0x4b   : > { %1987 = vmatpush3.msra.mxu1 %v313_v44  ;;  %1999 = vmatmul.mubr.f32.vlgmr.msra.gmra.mxu0 %v246_v26 }
  0x4c   : > { %1989 = vmatmul.mubr.f32.vlgmr.msra.gmra.mxu1 %v2405_v17  ;;  %2004 = vmatprep.subr.msk.mxu1 %vm2399_vm4, %v2268_v21 }
  0x4d   : > { %1991 = vmatprep.mubr.f32.mxu1 %v2417_v22  ;;  %2005 = vmatpush3.msk.msra.mxu1 %vm2399_vm4, %v2268_v21 }
  0x4e   : > { %2006 = vmatprep.subr.msk.mxu1 %vm2389_vm1, %v2268_v21  ;;  %2001 = vmatprep.mubr.f32.mxu0 %v256_v28  ;;  %v832_v28 = vsub.f32 %v2483_v5, %v2486_v15 }
  0x4f   : > { %2007 = vmatpush3.msk.msra.mxu1 %vm2389_vm1, %v2268_v21  ;;  %2015 = vmatpush3.msra.mxu0 %v305_v31 }
  0x50   : > { %1992 = vmatmul.mubr.f32.gmra.mxu1 %v265_v29  ;;  %2002 = vmatmul.mubr.f32.gmra.mxu0 %v266_v35  ;;  %v833_v38 = vand.u32 4294901760, %v832_v28 }
  0x51   : > { %2008 = vmatprep.mubr.f32.mxu1 %v237_v30  ;;  %2016 = vmatprep.subr.mxu0 %v311_v27 }
  0x52   : > { %2018 = vmatprep.mubr.f32.mxu0 %v2403_v16  ;;  %2017 = vmatpush3.msra.mxu0 %v311_v27 }
  0x53   : > { %2024 = vmatprep.subr.msk.mxu1 %vm2399_vm4, %v2268_v21 }
  0x54   : > { %2009 = vmatmul.mubr.f32.vlgmr.msra.gmra.mxu1 %v247_v32  ;;  %2019 = vmatmul.mubr.f32.vlgmr.msra.gmra.mxu0 %v2405_v17 }
  0x55   : > { %2011 = vmatprep.mubr.f32.mxu1 %v257_v34  ;;  %2025 = vmatpush3.msk.msra.mxu1 %vm2399_vm4, %v2268_v21 }
  0x56   : > { %2026 = vmatprep.subr.msk.mxu1 %vm2389_vm1, %v2268_v21  ;;  %2021 = vmatprep.mubr.f32.mxu0 %v2417_v22 }
  0x57   : > { %2027 = vmatpush3.msk.msra.mxu1 %vm2389_vm1, %v2268_v21 }
  0x58   : > { %2012 = vmatmul.mubr.f32.gmra.mxu1 %v267_v40  ;;  %2022 = vmatmul.mubr.f32.gmra.mxu0 %v265_v29 }
  0x59   : > { %2028 = vmatprep.mubr.f32.mxu1 %v2403_v16  ;;  %2038 = vmatprep.mubr.f32.mxu0 %v2478_v52 }
  0x5c   : > { %2029 = vmatmul.mubr.f32.vlgmr.msra.gmra.mxu1 %v2405_v17 }
  0x5d   : > { %2031 = vmatprep.mubr.f32.mxu1 %v2417_v22 }
  0x60   : > { %2032 = vmatmul.mubr.f32.gmra.mxu1 %v265_v29 }
  0x61   : > { %2045 = vmatprep.mubr.msk.f32.mxu1 %vm157_vm0, %v2395_v8 }
 0x103   : > { %v1980_v53 = vpop.f32.mrf.mxu0 }
 0x105   : > { %v241_v54 = vpop.f32.mrf.mxu0 }
 0x107   : > { %v1983_v56 = vpop.f32.mrf.mxu0 }
 0x109   : > { %v261_v58 = vpop.f32.mrf.mxu0 }
 0x10b   : > { %v2000_v60 = vpop.f32.mrf.mxu0 }
 0x10c   : > { %v1990_v55 = vpop.f32.mrf.mxu1 }
 0x10d   : > { %v357_v61 = vadd.f32 %v1990_v55, %v1980_v53  ;;  %v442_v0 = vpop.f32.mrf.mxu0 }
 0x10e   : > { %v350_v57 = vpop.f32.mrf.mxu1 }
 0x10f   : > { %v351_v1 = vadd.f32 %v350_v57, %v241_v54  ;;  %v450_v2 = vadd.f32 %v2000_v60, %v357_v61 }
 0x110   : > { %v1993_v59 = vpop.f32.mrf.mxu1  ;;  %v2003_v4 = vpop.f32.mrf.mxu0 }
 0x111   : > { %v443_v6 = vadd.f32 %v442_v0, %v351_v1  ;;  %v369_v9 = vadd.f32 %v1993_v59, %v1983_v56 }
 0x112   : > { %v362_v62 = vpop.f32.mrf.mxu1  ;;  %v456_v10 = vpop.f32.mrf.mxu0 }
 0x113   : > { %v464_v13 = vadd.f32 %v2003_v4, %v369_v9  ;;  %v363_v19 = vadd.f32 %v362_v62, %v261_v58 }
 0x114   : > { %v2010_v3 = vpop.f32.mrf.mxu1  ;;  %v2020_v14 = vpop.f32.mrf.mxu0 }
 0x115   : > { %v545_v11 = vadd.f32 %v2010_v3, %v450_v2  ;;  %v457_v24 = vadd.f32 %v456_v10, %v363_v19 }
 0x116   : > { %v536_v7 = vpop.f32.mrf.mxu1  ;;  %v635_v21 = vpop.f32.mrf.mxu0 }
 0x117   : > { %v537_v16 = vadd.f32 %v536_v7, %v443_v6  ;;  %v642_v17 = vadd.f32 %v2020_v14, %v545_v11 }
 0x118   : > { %v2013_v12 = vpop.f32.mrf.mxu1  ;;  %v2023_v27 = vpop.f32.mrf.mxu0 }
 0x119   : > { %v636_v22 = vadd.f32 %v635_v21, %v537_v16  ;;  %v561_v25 = vadd.f32 %v2013_v12, %v464_v13 }
 0x11a   : > { %v552_v18 = vpop.f32.mrf.mxu1  ;;  %v647_v33 = vpop.f32.mrf.mxu0 }
 0x11b   : > { %v654_v31 = vadd.f32 %v2023_v27, %v561_v25  ;;  %v553_v35 = vadd.f32 %v552_v18, %v457_v24 }
 0x11c   : > { %v2030_v23 = vpop.f32.mrf.mxu1 }
 0x11d   : > { %v731_v26 = vadd.f32 %v2030_v23, %v642_v17  ;;  %v648_v40 = vadd.f32 %v647_v33, %v553_v35 }
 0x11e   : > { %v724_v29 = vpop.f32.mrf.mxu1 }
 0x11f   : > { %v781_v30 = vand.u32 4294901760, %v731_v26  ;;  %v725_v32 = vadd.f32 %v724_v29, %v636_v22 }
 0x120   : > { %v2033_v34 = vpop.f32.mrf.mxu1 }
 0x121   : > { %v869_v36 = vsub.f32 %v731_v26, %v781_v30  ;;  %v784_v37 = vand.u32 4294901760, %v725_v32  ;;  %2034 = vmatprep.subr.mxu0 %v781_v30  ;;  %v743_v41 = vadd.f32 %v2033_v34, %v654_v31 }
 0x122   : > { %2035 = vmatpush3.msra.mxu0 %v781_v30  ;;  %v736_v43 = vpop.f32.mrf.mxu1 }
 0x123   : > { %v876_v39 = vsub.f32 %v725_v32, %v784_v37  ;;  %2036 = vmatprep.subr.mxu0 %v784_v37  ;;  %v870_v42 = vand.u32 4294901760, %v869_v36  ;;  %v2491_v46 = vand.u32 4294901760, %v743_v41  ;;  %v737_v47 = vadd.f32 %v736_v43, %v648_v40 }
 0x124   : > { %2037 = vmatpush3.msra.mxu0 %v784_v37 }
 0x125   : > { %2048 = vmatprep.subr.mxu0 %v869_v36  ;;  %2039 = vmatmul.mubr.f32.vlgmr.msra.gmra.mxu0 %v833_v38  ;;  %v871_v44 = vsub.f32 %v869_v36, %v870_v42  ;;  %v877_v45 = vand.u32 4294901760, %v876_v39  ;;  %v1371_v54 = vsub.f32 %v743_v41, %v2491_v46  ;;  %v1286_v55 = vand.u32 4294901760, %v737_v47 }
 0x126   : > { %2049 = vmatpush3.msra.mxu0 %v869_v36  ;;  %2052 = vmatprep.mubr.f32.mxu0 %v2471_v49 }
 0x127   : > { %2050 = vmatprep.subr.mxu0 %v876_v39  ;;  %v872_v48 = vand.u32 4294901760, %v871_v44  ;;  %v878_v51 = vsub.f32 %v876_v39, %v877_v45  ;;  %v1378_v56 = vsub.f32 %v737_v47, %v1286_v55  ;;  %v1372_v57 = vand.u32 4294901760, %v1371_v54 }
 0x128   : > { %2051 = vmatpush3.msra.mxu0 %v876_v39 }
 0x129   : > { %2041 = vmatprep.subr.mxu1 %v872_v48  ;;  %2062 = vmatprep.subr.mxu0 %v870_v42  ;;  %v879_v53 = vand.u32 4294901760, %v878_v51  ;;  %v1373_v58 = vsub.f32 %v1371_v54, %v1372_v57  ;;  %v1379_v59 = vand.u32 4294901760, %v1378_v56 }
 0x12a   : > { %2042 = vmatpush3.msra.mxu1 %v872_v48  ;;  %2053 = vmatmul.mubr.f32.vlgmr.msra.gmra.mxu0 %v2483_v5 }
 0x12b   : > { %2063 = vmatpush3.msra.mxu0 %v870_v42  ;;  %2043 = vmatprep.subr.mxu1 %v879_v53  ;;  %v1374_v60 = vand.u32 4294901760, %v1373_v58  ;;  %v1380_v61 = vsub.f32 %v1378_v56, %v1379_v59 }
 0x12c   : > { %2064 = vmatprep.subr.mxu0 %v877_v45  ;;  %2044 = vmatpush3.msra.mxu1 %v879_v53 }
 0x12d   : > { %2065 = vmatpush3.msra.mxu0 %v877_v45  ;;  %2055 = vmatprep.subr.mxu1 %v781_v30 }
 0x12e   : > { %2066 = vmatprep.mubr.msk.f32.mxu0 %vm157_vm0, %v2395_v8  ;;  %2076 = vmatprep.subr.mxu0 %v2491_v46 }
 0x12f   : > { %2046 = vmatmul.mubr.msk.f32.vlgmr.msra.gmra.mxu1 %vm157_vm0, %v2412_v20  ;;  %2067 = vmatmul.mubr.msk.f32.vlgmr.msra.gmra.mxu0 %vm157_vm0, %v2412_v20 }
 0x130   : > { %2056 = vmatpush3.msra.mxu1 %v781_v30  ;;  %2077 = vmatpush3.msra.mxu0 %v2491_v46 }
 0x131   : > { %2057 = vmatprep.subr.mxu1 %v784_v37  ;;  %2078 = vmatprep.subr.mxu0 %v1286_v55 }
 0x132   : > { %2058 = vmatpush3.msra.mxu1 %v784_v37  ;;  %2079 = vmatpush3.msra.mxu0 %v1286_v55 }
 0x133   : > { %2059 = vmatprep.mubr.f32.mxu1 %v2474_v50  ;;  %2069 = vmatprep.subr.mxu1 %v781_v30 }
 0x134   : > { %2080 = vmatprep.mubr.f32.mxu0 %v2478_v52  ;;  %2090 = vmatprep.subr.mxu0 %v1371_v54  ;;  %v1381_v52 = vand.u32 4294901760, %v1380_v61 }
 0x135   : > { %2060 = vmatmul.mubr.f32.vlgmr.msra.gmra.mxu1 %v2486_v15  ;;  %2081 = vmatmul.mubr.f32.vlgmr.msra.gmra.mxu0 %v833_v38 }
 0x136   : > { %2070 = vmatpush3.msra.mxu1 %v781_v30  ;;  %2091 = vmatpush3.msra.mxu0 %v1371_v54 }
 0x137   : > { %2071 = vmatprep.subr.mxu1 %v784_v37  ;;  %2092 = vmatprep.subr.mxu0 %v1378_v56 }
 0x138   : > { %2072 = vmatpush3.msra.mxu1 %v784_v37  ;;  %2093 = vmatpush3.msra.mxu0 %v1378_v56 }
 0x139   : > { %2073 = vmatprep.mubr.msk.f32.mxu1 %vm157_vm0, %v2395_v8  ;;  %2083 = vmatprep.subr.mxu1 %v1374_v60 }
 0x13a   : > { %2094 = vmatprep.mubr.f32.mxu0 %v2471_v49  ;;  %2104 = vmatprep.subr.mxu0 %v1372_v57 }
 0x13b   : > { %2074 = vmatmul.mubr.msk.f32.vlgmr.msra.gmra.mxu1 %vm157_vm0, %v2412_v20  ;;  %2095 = vmatmul.mubr.f32.vlgmr.msra.gmra.mxu0 %v2483_v5 }
 0x13c   : > { %2084 = vmatpush3.msra.mxu1 %v1374_v60  ;;  %2105 = vmatpush3.msra.mxu0 %v1372_v57 }
 0x13d   : > { %2085 = vmatprep.subr.mxu1 %v1381_v52  ;;  %2106 = vmatprep.subr.mxu0 %v1379_v59 }
 0x13e   : > { %2086 = vmatpush3.msra.mxu1 %v1381_v52  ;;  %2107 = vmatpush3.msra.mxu0 %v1379_v59 }
 0x13f   : > { %2087 = vmatprep.mubr.msk.f32.mxu1 %vm157_vm0, %v2395_v8  ;;  %2097 = vmatprep.subr.mxu1 %v2491_v46 }
 0x140   : > { %2088 = vmatmul.mubr.msk.f32.vlgmr.msra.gmra.mxu1 %vm157_vm0, %v2412_v20  ;;  %2108 = vmatprep.mubr.msk.f32.mxu0 %vm157_vm0, %v2395_v8 }
 0x141   : > { %2098 = vmatpush3.msra.mxu1 %v2491_v46  ;;  %2101 = vmatprep.mubr.f32.mxu1 %v2474_v50 }
 0x142   : > { %2099 = vmatprep.subr.mxu1 %v1286_v55  ;;  %2109 = vmatmul.mubr.msk.f32.vlgmr.msra.gmra.mxu0 %vm157_vm0, %v2412_v20 }
 0x143   : > { %2100 = vmatpush3.msra.mxu1 %v1286_v55 }
 0x144   : > { %2111 = vmatprep.subr.mxu1 %v2491_v46  ;;  %2102 = vmatmul.mubr.f32.vlgmr.msra.gmra.mxu1 %v2486_v15 }
 0x145   : > { %2112 = vmatpush3.msra.mxu1 %v2491_v46  ;;  %2115 = vmatprep.mubr.msk.f32.mxu1 %vm157_vm0, %v2395_v8 }
 0x146   : > { %2113 = vmatprep.subr.mxu1 %v1286_v55 }
 0x147   : > { %2114 = vmatpush3.msra.mxu1 %v1286_v55 }
 0x148   : > { %2116 = vmatmul.mubr.msk.f32.vlgmr.msra.gmra.mxu1 %vm157_vm0, %v2412_v20 }
 0x1e5   : > { %v2040_v49 = vpop.f32.mrf.mxu0 }
 0x1e7   : > { %v825_v50 = vpop.f32.mrf.mxu0 }
 0x1ea   : > { %v2054_v62 = vpop.f32.mrf.mxu0 }
 0x1ec   : > { %v998_v63 = vpop.f32.mrf.mxu0 }
 0x1ef   : > { %v2047_v0 = vpop.f32.mrf.mxu1  ;;  %v2068_v1 = vpop.f32.mrf.mxu0 }
 0x1f0   : > { %v923_v2 = vadd.f32 %v2047_v0, %v2040_v49 }
 0x1f1   : > { %v916_v3 = vpop.f32.mrf.mxu1  ;;  %v1165_v4 = vpop.f32.mrf.mxu0 }
 0x1f2   : > { %v917_v5 = vadd.f32 %v916_v3, %v825_v50  ;;  %v1006_v6 = vadd.f32 %v2054_v62, %v923_v2 }
 0x1f4   : > { %v999_v7 = vadd.f32 %v998_v63, %v917_v5 }
 0x1f5   : > { %v2061_v9 = vpop.f32.mrf.mxu1  ;;  %v2082_v8 = vpop.f32.mrf.mxu0 }
 0x1f6   : > { %v1089_v10 = vadd.f32 %v2061_v9, %v1006_v6 }
 0x1f7   : > { %v1080_v11 = vpop.f32.mrf.mxu1  ;;  %v1327_v20 = vpop.f32.mrf.mxu0 }
 0x1f8   : > { %v1081_v12 = vadd.f32 %v1080_v11, %v999_v7  ;;  %v1172_v13 = vadd.f32 %v2068_v1, %v1089_v10 }
 0x1fa   : > { %v1166_v14 = vadd.f32 %v1165_v4, %v1081_v12 }
 0x1fb   : > { %v2075_v15 = vpop.f32.mrf.mxu1  ;;  %v2096_v17 = vpop.f32.mrf.mxu0 }
 0x1fc   : > { %v1251_v16 = vadd.f32 %v2075_v15, %v1172_v13 }
 0x1fd   : > { %v1244_v18 = vpop.f32.mrf.mxu1  ;;  %v1500_v24 = vpop.f32.mrf.mxu0 }
 0x1fe   : > { %v1757_v19 = vmul.f32 0.0044444446, %v1251_v16  ;;  %v1245_v21 = vadd.f32 %v1244_v18, %v1166_v14 }
 0x200   : > { %1761 = vst.msk [vmem:[%s135_s17 + $0x8] sm:$0xff] %vm157_vm0, %v1757_v19  ;;  %v1756_v22 = vmul.f32 0.0044444446, %v1245_v21  ;;  %v2089_v23 = vpop.f32.mrf.mxu1 }
 0x201   : > { %v1425_v25 = vadd.f32 %v2089_v23, %v2082_v8 }
 0x202   : > { %1760 = vst.msk [vmem:[%s135_s17] sm:$0xff] %vm157_vm0, %v1756_v22  ;;  %v1418_v26 = vpop.f32.mrf.mxu1  ;;  %v2110_v30 = vpop.f32.mrf.mxu0 }
 0x203   : > { %v1419_v27 = vadd.f32 %v1418_v26, %v1327_v20  ;;  %v1508_v28 = vadd.f32 %v2096_v17, %v1425_v25 }
 0x204   : > { %v2103_v29 = vpop.f32.mrf.mxu1  ;;  %v1667_v36 = vpop.f32.mrf.mxu0 }
 0x205   : > { %v1501_v31 = vadd.f32 %v1500_v24, %v1419_v27  ;;  %v1591_v32 = vadd.f32 %v2103_v29, %v1508_v28 }
 0x206   : > { %v1582_v33 = vpop.f32.mrf.mxu1 }
 0x207   : > { %v1583_v34 = vadd.f32 %v1582_v33, %v1501_v31  ;;  %v1674_v35 = vadd.f32 %v2110_v30, %v1591_v32 }
 0x208   : > { %v2117_v37 = vpop.f32.mrf.mxu1 }
 0x209   : > { %v1668_v38 = vadd.f32 %v1667_v36, %v1583_v34  ;;  %v1753_v39 = vadd.f32 %v2117_v37, %v1674_v35 }
 0x20a   : > { %v1746_v40 = vpop.f32.mrf.mxu1 }
 0x20b   : > { %v1759_v41 = vmul.f32 0.0044444446, %v1753_v39  ;;  %v1747_v42 = vadd.f32 %v1746_v40, %v1668_v38 }
 0x20d   : > { %1763 = vst.msk [vmem:[%s135_s17 + $0x18] sm:$0xff] %vm157_vm0, %v1759_v41  ;;  %v1758_v43 = vmul.f32 0.0044444446, %v1747_v42 }
 0x20f   : > { %1762 = vst.msk [vmem:[%s135_s17 + $0x10] sm:$0xff] %vm157_vm0, %v1758_v43 }
 0x210   : > { %2211 = shalt.err (!%p2208_p10)
}
 0x211   : > { %s2212_s13 = scalar_lea.hbm %s2540_s2, 512  ;;  %s2216_s20 = scalar_lea.hbm %s2586_s1, 1024 }
 0x212   : > { %p2213_p0 = scmp.ne.s32.totalorder %s2540_s2, %s2212_s13  ;;  %p2217_p1 = scmp.lt.s32.totalorder %s2540_s2, %s2586_s1 }
 0x213   : > { %p2218_p3 = scmp.lt.s32.totalorder %s2216_s20, %s2212_s13 }
 0x214   : > { %p2214_p2 = pnand %p2213_p0, %p2599_p12 }
 0x215   : > { %p2219_p6 = por %p2218_p3, %p2217_p1 }
 0x216   : > { %p2215_p9 = pneg %p2214_p2 }
 0x218   : > { %p2220_p11 = pnand %p2219_p6, %p2215_p9 }
 0x21a   : > { %2223 = shalt.err (!%p2220_p11)
}
 0x21b   : > { %s2270_s24 = smov 128   ;;  %s2271_s26 = smov 8  }
 0x21c   : > { %2120 = dma.vmem_to_hbm [thread:$0]  (%p2599_p12), %s2535_s25, 512, %s2540_s2, %s1765_s3, %s2270_s24, %s2270_s24, %s2271_s26  }
 0x21d PF: > { %s1794_s30 = sand.u32 1, %s2250_s6   ;;  %p2600_p13 = scmp.ne.s32.totalorder %s2592_s19, 0 }
 0x21e   : > { %p2601_p4 = scmp.ge.s32.totalorder %s2262_s9, 2  ;;  %s1795_s17 = scalar_lea.sflag [#allocation4], %s1794_s30 }
 0x220   : > { %p2127_p5 = pnand %p2601_p4, %p2600_p13 }
 0x222   : > { %p2128_p7 = pneg %p2127_p5 }
 0x224   : > { %2245 = dma.done.wait (%p2128_p7), %s1795_s17, 512  }
 0x225   : > { %2247 = vsyncadd (%p2128_p7), %s1795_s17, 4294966784  ;;  %p14_p8 = scmp.ge.s32.totalorder %s2307_s12, 4   ;;  %s2602_s6 = smov %s2254_s7 }
 0x226   : > { %s2603_s7 = smov %s2258_s8  ;;  %s2604_s8 = smov %s2319_s15 }
 0x227   : > { %s2605_s9 = smov %s2307_s12  ;;  %16 = sbr.rel (!%p14_p8) target bundleno = 5 (0x5), region = 69 }
 0x22c   :  { %1800 = vsyncpa [#allocation3], 1 }
 0x22d   :  { %1802 = vsyncpa [#allocation3 + $0x1], 1 }
 0x22e   :  { %1803 = vsyncpa [#allocation4], 1 }
 0x22f   :  { %1805 = vsyncpa [#allocation4 + $0x1], 1 }

</bundles_post_ra>
